<compile_context>
chip_gen: v7x
topology: tpu7x:2x2x1
jax: 0.10.0
libtpu: 0.0.40
codegen_flags: <defaults>
</compile_context>

<pallas_src>
import functools

import jax
import jax.numpy as jnp
from jax import lax
from jax.experimental import pallas as pl
from jax.experimental.pallas import tpu as pltpu


def _round_up(x, m):
    return ((x + m - 1) // m) * m


# ----------------------------------------------------------------------------
# Fused kernel: patch-embed matmul -> ReLU -> GAP -> ProjectionHead -> LayerNorm
# ----------------------------------------------------------------------------
def _image_encoder_kernel(x_ref, pool_ref, cw_ref, cb_ref, w1_ref, b1_ref,
                          w2_ref, b2_ref, g_ref, bt_ref, o_ref, *, proj_dim):
    # x_ref:    [TB*Np, Kp]   bf16  flattened patches for this batch tile
    # pool_ref: [TB, TB*Np]   bf16  block-diagonal 1/Np pooling matrix
    # cw_ref:   [Kp, Ep]      bf16  conv weight as a matmul (zero-padded)
    # cb_ref:   [1, Ep]       f32   conv bias (zero-padded)
    # w1_ref:   [Ep, Pp]      bf16  projection weight (in, out), zero-padded
    # b1_ref:   [1, Pp]       f32
    # w2_ref:   [Pp, Pp]      bf16  fc weight, zero-padded
    # b2_ref:   [1, Pp]       f32
    # g_ref:    [1, Pp]       f32   LayerNorm gamma (zero-padded)
    # bt_ref:   [1, Pp]       f32   LayerNorm beta  (zero-padded)
    # o_ref:    [TB, Pp]      f32   embeddings (padded cols are exactly 0)

    # ---- backbone: patch-embed conv as matmul (MXU, bf16 in / f32 acc) ----
    h = jnp.dot(x_ref[...], cw_ref[...], preferred_element_type=jnp.float32)
    h = jnp.maximum(h + cb_ref[...], 0.0)                      # bias + ReLU (VPU)

    # global average pool as a matmul: pooled[b,e] = sum_n pool[b,n] * h[n,e]
    # (keeps the cross-sublane reduction on the MXU, XLU stays free)
    feats = jnp.dot(pool_ref[...], h.astype(jnp.bfloat16),
                    preferred_element_type=jnp.float32)        # [TB, Ep]

    # ---- ProjectionHead ----
    projected = jnp.dot(feats.astype(jnp.bfloat16), w1_ref[...],
                        preferred_element_type=jnp.float32) + b1_ref[...]
    # exact GELU (nn.GELU default): 0.5*x*(1+erf(x/sqrt(2)))  (erf -> EUP)
    inv_sqrt2 = jnp.float32(0.7071067811865476)
    gelu = 0.5 * projected * (1.0 + lax.erf(projected * inv_sqrt2))
    x = jnp.dot(gelu.astype(jnp.bfloat16), w2_ref[...],
                preferred_element_type=jnp.float32) + b2_ref[...]
    # nn.Dropout in eval/inference mode is the identity.
    x = x + projected

    # LayerNorm over the *real* proj_dim columns (last dim padded to Pp).
    # Padded columns of x are exactly 0 (all pads are zeros), so only the
    # variance needs an explicit mask.
    inv_p = jnp.float32(1.0 / proj_dim)
    mean = jnp.sum(x, axis=-1, keepdims=True) * inv_p
    col = lax.broadcasted_iota(jnp.int32, x.shape, 1)
    mask = (col < proj_dim).astype(jnp.float32)
    diff = (x - mean) * mask
    var = jnp.sum(diff * diff, axis=-1, keepdims=True) * inv_p
    y = diff * lax.rsqrt(var + jnp.float32(1e-5))
    o_ref[...] = y * g_ref[...] + bt_ref[...]   # padded cols: gamma=beta=0 -> 0


# ----------------------------------------------------------------------------
# Wrapper: padding, patch extraction (layout plumbing), single pallas_call
# ----------------------------------------------------------------------------
def image_encoder_forward(img, params, patch, *, batch_tile=8):
    assert batch_tile % 8 == 0
    B, C, H, W = img.shape
    E = params["conv_w"].shape[1]
    P = params["w1"].shape[1]
    Np = (H // patch) * (W // patch)
    K = C * patch * patch

    # lane-dense padded widths
    Kp = _round_up(K, 128)
    Ep = _round_up(E, 128)
    Pp = _round_up(P, 128)

    # batch tiling: either one full-array block, or 8-aligned tiles
    if B <= batch_tile:
        TB, B_pad = B, B
    else:
        TB = batch_tile
        B_pad = _round_up(B, TB)

    if B_pad != B:
        img = jnp.pad(img, ((0, B_pad - B), (0, 0), (0, 0), (0, 0)))

    # Patch extraction (pure layout plumbing; done once in XLA).
    # TODO(synk): for large images fold this into the BlockSpec DMA with a
    # (b, hp, wp) grid instead of materializing the patch matrix in HBM.
    x = img.reshape(B_pad, C, H // patch, patch, W // patch, patch)
    x = x.transpose(0, 2, 4, 1, 3, 5).reshape(B_pad * Np, K)
    x = jnp.pad(x, ((0, 0), (0, Kp - K))).astype(jnp.bfloat16)

    # block-diagonal pooling matrix: pool[b, b*Np + n] = 1/Np
    pool = (jnp.repeat(jnp.eye(TB, dtype=jnp.float32), Np, axis=1)
            / float(Np)).astype(jnp.bfloat16)                    # [TB, TB*Np]

    def pad2(a, r, c):
        return jnp.pad(a, ((0, r - a.shape[0]), (0, c - a.shape[1])))

    cw = pad2(params["conv_w"], Kp, Ep).astype(jnp.bfloat16)
    cb = pad2(params["conv_b"], 1, Ep)
    w1 = pad2(params["w1"], Ep, Pp).astype(jnp.bfloat16)
    b1 = pad2(params["b1"], 1, Pp)
    w2 = pad2(params["w2"], Pp, Pp).astype(jnp.bfloat16)
    b2 = pad2(params["b2"], 1, Pp)
    gamma = pad2(params["gamma"], 1, Pp)
    beta = pad2(params["beta"], 1, Pp)

    flops = (2 * B_pad * Np * Kp * Ep      # patch embed
             + 2 * B_pad * Np * Ep         # global average pool
             + 2 * B_pad * Ep * Pp         # projection
             + 2 * B_pad * Pp * Pp)        # fc
    bytes_accessed = (x.size * 2 + pool.size * 2
                      + (cw.size + w1.size + w2.size) * 2
                      + (cb.size + b1.size + b2.size + gamma.size + beta.size) * 4
                      + B_pad * Pp * 4)
    cost = pl.CostEstimate(flops=flops, transcendentals=B_pad * Pp,
                           bytes_accessed=bytes_accessed)

    kernel = functools.partial(_image_encoder_kernel, proj_dim=P)
    out = pl.pallas_call(
        kernel,
        out_shape=jax.ShapeDtypeStruct((B_pad, Pp), jnp.float32),
        grid=(B_pad // TB,),
        in_specs=[
            pl.BlockSpec((TB * Np, Kp), lambda i: (i, 0)),   # patches (tiled)
            pl.BlockSpec((TB, TB * Np), lambda i: (0, 0)),   # pooling matrix
            pl.BlockSpec((Kp, Ep), lambda i: (0, 0)),        # conv weight
            pl.BlockSpec((1, Ep), lambda i: (0, 0)),         # conv bias
            pl.BlockSpec((Ep, Pp), lambda i: (0, 0)),        # proj weight
            pl.BlockSpec((1, Pp), lambda i: (0, 0)),         # proj bias
            pl.BlockSpec((Pp, Pp), lambda i: (0, 0)),        # fc weight
            pl.BlockSpec((1, Pp), lambda i: (0, 0)),         # fc bias
            pl.BlockSpec((1, Pp), lambda i: (0, 0)),         # gamma
            pl.BlockSpec((1, Pp), lambda i: (0, 0)),         # beta
        ],
        out_specs=pl.BlockSpec((TB, Pp), lambda i: (i, 0)),
        compiler_params=pltpu.CompilerParams(
            dimension_semantics=("parallel",),
            vmem_limit_bytes=64 * 1024 * 1024),
        cost_estimate=cost,
    )(x, pool, cw, cb, w1, b1, w2, b2, gamma, beta)

    return out[:B, :P]


# ----------------------------------------------------------------------------
# Pure-JAX f32 reference (same math) for a sanity check
# ----------------------------------------------------------------------------
def reference_forward(img, params, patch):
    B, C, H, W = img.shape
    Np = (H // patch) * (W // patch)
    K = C * patch * patch
    x = img.reshape(B, C, H // patch, patch, W // patch, patch)
    patches = x.transpose(0, 2, 4, 1, 3, 5).reshape(B * Np, K)
    h = patches @ params["conv_w"] + params["conv_b"]
    h = jnp.maximum(h, 0.0).reshape(B, Np, -1)
    feats = jnp.mean(h, axis=1)
    projected = feats @ params["w1"] + params["b1"]
    g = 0.5 * projected * (1.0 + lax.erf(projected / jnp.sqrt(2.0)))
    y = g @ params["w2"] + params["b2"]
    y = y + projected
    mean = jnp.mean(y, axis=-1, keepdims=True)
    var = jnp.mean((y - mean) ** 2, axis=-1, keepdims=True)
    y = (y - mean) / jnp.sqrt(var + 1e-5)
    return y * params["gamma"] + params["beta"]


if __name__ == "__main__":
    # Small shapes consistent with the module's forward:
    B, C, H, W = 2, 4, 16, 16
    PATCH = 4
    EMBED_DIM = 32          # embedding_dim (backbone feature width)
    PROJ_DIM = 32           # projection_dim

    key = jax.random.PRNGKey(0)
    ks = jax.random.split(key, 8)

    K = C * PATCH * PATCH
    params = {
        # conv weight stored as [K, E] (PyTorch conv weight (E,C,P,P) flattened
        # over (C,P,P) and transposed); linear weights stored as (in, out).
        "conv_w": 0.05 * jax.random.normal(ks[0], (K, EMBED_DIM), jnp.float32),
        "conv_b": 0.01 * jax.random.normal(ks[1], (1, EMBED_DIM), jnp.float32),
        "w1": 0.05 * jax.random.normal(ks[2], (EMBED_DIM, PROJ_DIM), jnp.float32),
        "b1": 0.01 * jax.random.normal(ks[3], (1, PROJ_DIM), jnp.float32),
        "w2": 0.05 * jax.random.normal(ks[4], (PROJ_DIM, PROJ_DIM), jnp.float32),
        "b2": 0.01 * jax.random.normal(ks[5], (1, PROJ_DIM), jnp.float32),
        "gamma": jnp.ones((1, PROJ_DIM), jnp.float32),
        "beta": jnp.zeros((1, PROJ_DIM), jnp.float32),
    }

    img = jax.random.normal(ks[6], (B, C, H, W), jnp.float32)

    fwd = jax.jit(functools.partial(image_encoder_forward, patch=PATCH))
    out = fwd(img, params)
    out = jax.block_until_ready(out)

    ref = reference_forward(img, params, PATCH)
    assert out.shape == (B, PROJ_DIM)
    # bf16 MXU inputs (f32 accumulation) vs. pure-f32 reference -> loose tol.
    assert jnp.allclose(out, ref, rtol=5e-2, atol=5e-2), "mismatch vs reference"

    print("KERNEL_OK")
</pallas_src>

<mosaic_0001>
module attributes {stable_mosaic.version = 11 : i64} {
  func.func @_image_encoder_kernel(%arg0: i32, %arg1: memref<32x128xbf16, #tpu.memory_space<vmem>>, %arg2: memref<2x32xbf16, #tpu.memory_space<vmem>>, %arg3: memref<128x128xbf16, #tpu.memory_space<vmem>>, %arg4: memref<1x128xf32, #tpu.memory_space<vmem>>, %arg5: memref<128x128xbf16, #tpu.memory_space<vmem>>, %arg6: memref<1x128xf32, #tpu.memory_space<vmem>>, %arg7: memref<128x128xbf16, #tpu.memory_space<vmem>>, %arg8: memref<1x128xf32, #tpu.memory_space<vmem>>, %arg9: memref<1x128xf32, #tpu.memory_space<vmem>>, %arg10: memref<1x128xf32, #tpu.memory_space<vmem>>, %arg11: memref<2x128xf32, #tpu.memory_space<vmem>>) attributes {dimension_semantics = [#tpu.dimension_semantics<parallel>], iteration_bounds = array<i64: 1>, scalar_prefetch = 0 : i64, scratch_operands = 0 : i64, tpu.core_type = #tpu.core_type<tc>, window_params = [{transform_indices = @transform_0, window_bounds = array<i64: 32, 128>}, {pipeline_mode = #tpu.pipeline_mode<synchronous>, transform_indices = @transform_1, window_bounds = array<i64: 2, 32>}, {pipeline_mode = #tpu.pipeline_mode<synchronous>, transform_indices = @transform_2, window_bounds = array<i64: 128, 128>}, {pipeline_mode = #tpu.pipeline_mode<synchronous>, transform_indices = @transform_3, window_bounds = array<i64: 1, 128>}, {pipeline_mode = #tpu.pipeline_mode<synchronous>, transform_indices = @transform_4, window_bounds = array<i64: 128, 128>}, {pipeline_mode = #tpu.pipeline_mode<synchronous>, transform_indices = @transform_5, window_bounds = array<i64: 1, 128>}, {pipeline_mode = #tpu.pipeline_mode<synchronous>, transform_indices = @transform_6, window_bounds = array<i64: 128, 128>}, {pipeline_mode = #tpu.pipeline_mode<synchronous>, transform_indices = @transform_7, window_bounds = array<i64: 1, 128>}, {pipeline_mode = #tpu.pipeline_mode<synchronous>, transform_indices = @transform_8, window_bounds = array<i64: 1, 128>}, {pipeline_mode = #tpu.pipeline_mode<synchronous>, transform_indices = @transform_9, window_bounds = array<i64: 1, 128>}, {transform_indices = @transform_10, window_bounds = array<i64: 2, 128>}]} {
    %c0 = arith.constant 0 : index
    %c0_0 = arith.constant 0 : index
    %0 = vector.load %arg1[%c0, %c0_0] : memref<32x128xbf16, #tpu.memory_space<vmem>>, vector<32x128xbf16>
    %c0_1 = arith.constant 0 : index
    %c0_2 = arith.constant 0 : index
    %1 = vector.load %arg3[%c0_1, %c0_2] : memref<128x128xbf16, #tpu.memory_space<vmem>>, vector<128x128xbf16>
    %cst = arith.constant dense<0.000000e+00> : vector<32x128xf32>
    %2 = tpu.matmul %0, %1, %cst {dimension_numbers = #tpu.dot_dimension_numbers<[1], [0], [0], [1], [0, 0, 1, 1], [], []>} : vector<32x128xbf16>, vector<128x128xbf16>, vector<32x128xf32> -> vector<32x128xf32>
    %c0_3 = arith.constant 0 : index
    %c0_4 = arith.constant 0 : index
    %3 = vector.load %arg4[%c0_3, %c0_4] : memref<1x128xf32, #tpu.memory_space<vmem>>, vector<1x128xf32>
    %4 = vector.broadcast %3 : vector<1x128xf32> to vector<32x128xf32>
    %5 = arith.addf %2, %4 : vector<32x128xf32>
    %cst_5 = arith.constant 0.000000e+00 : f32
    %6 = vector.broadcast %cst_5 : f32 to vector<32x128xf32>
    %7 = arith.maximumf %5, %6 : vector<32x128xf32>
    %c0_6 = arith.constant 0 : index
    %c0_7 = arith.constant 0 : index
    %8 = vector.load %arg2[%c0_6, %c0_7] : memref<2x32xbf16, #tpu.memory_space<vmem>>, vector<2x32xbf16>
    %9 = arith.truncf %7 : vector<32x128xf32> to vector<32x128xbf16>
    %cst_8 = arith.constant dense<0.000000e+00> : vector<2x128xf32>
    %10 = tpu.matmul %8, %9, %cst_8 {dimension_numbers = #tpu.dot_dimension_numbers<[1], [0], [0], [1], [0, 0, 1, 1], [], []>} : vector<2x32xbf16>, vector<32x128xbf16>, vector<2x128xf32> -> vector<2x128xf32>
    %11 = arith.truncf %10 : vector<2x128xf32> to vector<2x128xbf16>
    %c0_9 = arith.constant 0 : index
    %c0_10 = arith.constant 0 : index
    %12 = vector.load %arg5[%c0_9, %c0_10] : memref<128x128xbf16, #tpu.memory_space<vmem>>, vector<128x128xbf16>
    %cst_11 = arith.constant dense<0.000000e+00> : vector<2x128xf32>
    %13 = tpu.matmul %11, %12, %cst_11 {dimension_numbers = #tpu.dot_dimension_numbers<[1], [0], [0], [1], [0, 0, 1, 1], [], []>} : vector<2x128xbf16>, vector<128x128xbf16>, vector<2x128xf32> -> vector<2x128xf32>
    %c0_12 = arith.constant 0 : index
    %c0_13 = arith.constant 0 : index
    %14 = vector.load %arg6[%c0_12, %c0_13] : memref<1x128xf32, #tpu.memory_space<vmem>>, vector<1x128xf32>
    %15 = vector.broadcast %14 : vector<1x128xf32> to vector<2x128xf32>
    %16 = arith.addf %13, %15 : vector<2x128xf32>
    %cst_14 = arith.constant 5.000000e-01 : f32
    %17 = vector.broadcast %cst_14 : f32 to vector<2x128xf32>
    %18 = arith.mulf %17, %16 : vector<2x128xf32>
    %cst_15 = arith.constant 0.707106769 : f32
    %19 = vector.broadcast %cst_15 : f32 to vector<2x128xf32>
    %20 = arith.mulf %16, %19 : vector<2x128xf32>
    %21 = math.erf %20 : vector<2x128xf32>
    %cst_16 = arith.constant 1.000000e+00 : f32
    %22 = vector.broadcast %cst_16 : f32 to vector<2x128xf32>
    %23 = arith.addf %22, %21 : vector<2x128xf32>
    %24 = arith.mulf %18, %23 : vector<2x128xf32>
    %25 = arith.truncf %24 : vector<2x128xf32> to vector<2x128xbf16>
    %c0_17 = arith.constant 0 : index
    %c0_18 = arith.constant 0 : index
    %26 = vector.load %arg7[%c0_17, %c0_18] : memref<128x128xbf16, #tpu.memory_space<vmem>>, vector<128x128xbf16>
    %cst_19 = arith.constant dense<0.000000e+00> : vector<2x128xf32>
    %27 = tpu.matmul %25, %26, %cst_19 {dimension_numbers = #tpu.dot_dimension_numbers<[1], [0], [0], [1], [0, 0, 1, 1], [], []>} : vector<2x128xbf16>, vector<128x128xbf16>, vector<2x128xf32> -> vector<2x128xf32>
    %c0_20 = arith.constant 0 : index
    %c0_21 = arith.constant 0 : index
    %28 = vector.load %arg8[%c0_20, %c0_21] : memref<1x128xf32, #tpu.memory_space<vmem>>, vector<1x128xf32>
    %29 = vector.broadcast %28 : vector<1x128xf32> to vector<2x128xf32>
    %30 = arith.addf %27, %29 : vector<2x128xf32>
    %31 = arith.addf %30, %16 : vector<2x128xf32>
    %cst_22 = arith.constant dense<0.000000e+00> : vector<2xf32>
    %32 = vector.multi_reduction <add>, %31, %cst_22 [1] : vector<2x128xf32> to vector<2xf32>
    %33 = vector.shape_cast %32 : vector<2xf32> to vector<2x1xf32>
    %cst_23 = arith.constant 3.125000e-02 : f32
    %34 = vector.broadcast %cst_23 : f32 to vector<2x1xf32>
    %35 = arith.mulf %33, %34 : vector<2x1xf32>
    %36 = tpu.iota {dimensions = array<i32: 1>} : vector<2x128xi32>
    %c32_i32 = arith.constant 32 : i32
    %37 = vector.broadcast %c32_i32 : i32 to vector<2x128xi32>
    %38 = arith.cmpi slt, %36, %37 : vector<2x128xi32>
    %39 = arith.extui %38 : vector<2x128xi1> to vector<2x128xi32>
    %40 = arith.sitofp %39 : vector<2x128xi32> to vector<2x128xf32>
    %41 = vector.broadcast %35 : vector<2x1xf32> to vector<2x128xf32>
    %42 = arith.subf %31, %41 : vector<2x128xf32>
    %43 = arith.mulf %42, %40 : vector<2x128xf32>
    %44 = arith.mulf %43, %43 : vector<2x128xf32>
    %cst_24 = arith.constant dense<0.000000e+00> : vector<2xf32>
    %45 = vector.multi_reduction <add>, %44, %cst_24 [1] : vector<2x128xf32> to vector<2xf32>
    %46 = vector.shape_cast %45 : vector<2xf32> to vector<2x1xf32>
    %cst_25 = arith.constant 3.125000e-02 : f32
    %47 = vector.broadcast %cst_25 : f32 to vector<2x1xf32>
    %48 = arith.mulf %46, %47 : vector<2x1xf32>
    %cst_26 = arith.constant 9.99999974E-6 : f32
    %49 = vector.broadcast %cst_26 : f32 to vector<2x1xf32>
    %50 = arith.addf %48, %49 : vector<2x1xf32>
    %51 = math.rsqrt %50 : vector<2x1xf32>
    %52 = vector.broadcast %51 : vector<2x1xf32> to vector<2x128xf32>
    %53 = arith.mulf %43, %52 : vector<2x128xf32>
    %c0_27 = arith.constant 0 : index
    %c0_28 = arith.constant 0 : index
    %54 = vector.load %arg9[%c0_27, %c0_28] : memref<1x128xf32, #tpu.memory_space<vmem>>, vector<1x128xf32>
    %55 = vector.broadcast %54 : vector<1x128xf32> to vector<2x128xf32>
    %56 = arith.mulf %53, %55 : vector<2x128xf32>
    %c0_29 = arith.constant 0 : index
    %c0_30 = arith.constant 0 : index
    %57 = vector.load %arg10[%c0_29, %c0_30] : memref<1x128xf32, #tpu.memory_space<vmem>>, vector<1x128xf32>
    %58 = vector.broadcast %57 : vector<1x128xf32> to vector<2x128xf32>
    %59 = arith.addf %56, %58 : vector<2x128xf32>
    %c0_31 = arith.constant 0 : index
    %c0_32 = arith.constant 0 : index
    %60 = vector.load %arg11[%c0_31, %c0_32] : memref<2x128xf32, #tpu.memory_space<vmem>>, vector<2x128xf32>
    tpu.vector_store %arg11[%c0_31, %c0_32], %59 {strides = array<i32>} : memref<2x128xf32, #tpu.memory_space<vmem>>, vector<2x128xf32>,
    return
  }
  func.func @transform_0(%arg0: i32) -> (i32, i32) {
    %c0_i32 = arith.constant 0 : i32
    %c0_i32_0 = arith.constant 0 : i32
    return %arg0, %c0_i32 : i32, i32
  }
  func.func @transform_1(%arg0: i32) -> (i32, i32) {
    %c0_i32 = arith.constant 0 : i32
    %c0_i32_0 = arith.constant 0 : i32
    %c0_i32_1 = arith.constant 0 : i32
    return %c0_i32, %c0_i32_0 : i32, i32
  }
  func.func @transform_2(%arg0: i32) -> (i32, i32) {
    %c0_i32 = arith.constant 0 : i32
    %c0_i32_0 = arith.constant 0 : i32
    %c0_i32_1 = arith.constant 0 : i32
    return %c0_i32, %c0_i32_0 : i32, i32
  }
  func.func @transform_3(%arg0: i32) -> (i32, i32) {
    %c0_i32 = arith.constant 0 : i32
    %c0_i32_0 = arith.constant 0 : i32
    %c0_i32_1 = arith.constant 0 : i32
    return %c0_i32, %c0_i32_0 : i32, i32
  }
  func.func @transform_4(%arg0: i32) -> (i32, i32) {
    %c0_i32 = arith.constant 0 : i32
    %c0_i32_0 = arith.constant 0 : i32
    %c0_i32_1 = arith.constant 0 : i32
    return %c0_i32, %c0_i32_0 : i32, i32
  }
  func.func @transform_5(%arg0: i32) -> (i32, i32) {
    %c0_i32 = arith.constant 0 : i32
    %c0_i32_0 = arith.constant 0 : i32
    %c0_i32_1 = arith.constant 0 : i32
    return %c0_i32, %c0_i32_0 : i32, i32
  }
  func.func @transform_6(%arg0: i32) -> (i32, i32) {
    %c0_i32 = arith.constant 0 : i32
    %c0_i32_0 = arith.constant 0 : i32
    %c0_i32_1 = arith.constant 0 : i32
    return %c0_i32, %c0_i32_0 : i32, i32
  }
  func.func @transform_7(%arg0: i32) -> (i32, i32) {
    %c0_i32 = arith.constant 0 : i32
    %c0_i32_0 = arith.constant 0 : i32
    %c0_i32_1 = arith.constant 0 : i32
    return %c0_i32, %c0_i32_0 : i32, i32
  }
  func.func @transform_8(%arg0: i32) -> (i32, i32) {
    %c0_i32 = arith.constant 0 : i32
    %c0_i32_0 = arith.constant 0 : i32
    %c0_i32_1 = arith.constant 0 : i32
    return %c0_i32, %c0_i32_0 : i32, i32
  }
  func.func @transform_9(%arg0: i32) -> (i32, i32) {
    %c0_i32 = arith.constant 0 : i32
    %c0_i32_0 = arith.constant 0 : i32
    %c0_i32_1 = arith.constant 0 : i32
    return %c0_i32, %c0_i32_0 : i32, i32
  }
  func.func @transform_10(%arg0: i32) -> (i32, i32) {
    %c0_i32 = arith.constant 0 : i32
    %c0_i32_0 = arith.constant 0 : i32
    return %arg0, %c0_i32 : i32, i32
  }
}

</mosaic_0001>

<bundles_post_ra>
// kernel: image_encoder_forward.1
= control target key start
LH: loop header
LB: loop body
LE: loop exit
PB: predicated region body
PF: predicated region fallthrough
CT: control target
= control target key end

     0   :  { %15 = vsyncpa [#allocation3], 0  ;;  %s1307_s0 = inlined_call_operand.hbm [shape: bf16[32,128], index: 0, kind: input, shape index: {}]   ;;  %s1308_s1 = inlined_call_operand.hbm [shape: bf16[2,32], index: 1, kind: input, shape index: {}]   ;;  %s1309_s2 = inlined_call_operand.hbm [shape: bf16[128,128], index: 2, kind: input, shape index: {}]   ;;  %s1310_s3 = inlined_call_operand.hbm [shape: f32[1,128], index: 3, kind: input, shape index: {}]   ;;  %s1311_s4 = inlined_call_operand.hbm [shape: bf16[128,128], index: 4, kind: input, shape index: {}]   ;;  %s1312_s5 = inlined_call_operand.hbm [shape: f32[1,128], index: 5, kind: input, shape index: {}]   ;;  %s1313_s6 = inlined_call_operand.hbm [shape: bf16[128,128], index: 6, kind: input, shape index: {}]   ;;  %s1314_s7 = inlined_call_operand.hbm [shape: f32[1,128], index: 7, kind: input, shape index: {}]   ;;  %s1315_s8 = inlined_call_operand.hbm [shape: f32[1,128], index: 8, kind: input, shape index: {}]   ;;  %s1316_s9 = inlined_call_operand.hbm [shape: f32[1,128], index: 9, kind: input, shape index: {}]   ;;  %s1317_s10 = inlined_call_operand.hbm [shape: f32[2,128], index: 10, kind: output, shape index: {}]  }
   0x1   :  { %16 = vsyncpa [#allocation6], 0 }
   0x2   :  { %17 = vsyncpa [#allocation9], 0 }
   0x3   :  { %18 = vsyncpa [#allocation12], 0 }
   0x4   :  { %19 = vsyncpa [#allocation15], 0 }
   0x5   :  { %20 = vsyncpa [#allocation18], 0 }
   0x6   :  { %21 = vsyncpa [#allocation4], 0  ;;  %s1068_s13 = smov [#allocation5]   ;;  %s1069_s15 = smov [#allocation8]  }
   0x7   :  { %s40_s14 = sshll.u32 %s1068_s13, 4  ;;  %s62_s16 = sshll.u32 %s1069_s15, 4  ;;  %s41_s14 = int_to_ptr.vmem [resolvable:$true] %s40_s14  ;;  %s63_s16 = int_to_ptr.vmem [resolvable:$true] %s62_s16 }
   0x8   :  { %s812_s19 = scalar_lea.hbm %s1308_s1, 16 }
   0x9   :  { %p813_p0 = scmp.ne.s32.totalorder %s1308_s1, %s812_s19  ;;  %p816_p1 = scmp.lt.u32.totalorder %s812_s19, %s1308_s1 }
   0xb   :  { %p818_p2 = pnand %p816_p1, %p813_p0 }
   0xd   :  { %821 = shalt.err (!%p818_p2)
}
   0xe   :  { %s822_s24 = scalar_lea.vmem %s41_s14, 16  ;;  %s826_s25 = scalar_lea.vmem %s41_s14, 32 }
   0xf   :  { %p823_p3 = scmp.ne.s32.totalorder %s41_s14, %s822_s24  ;;  %p827_p4 = scmp.lt.s32.totalorder %s41_s14, %s41_s14 }
  0x10   :  { %p828_p5 = scmp.lt.s32.totalorder %s826_s25, %s822_s24 }
  0x12   :  { %p829_p6 = por %p828_p5, %p827_p4 }
  0x14   :  { %p830_p7 = pnand %p829_p6, %p823_p3 }
  0x16   :  { %833 = shalt.err (!%p830_p7)
}
  0x17   :  { %43 = dma.hbm_to_vmem [thread:$0]  %s1308_s1, 16, %s41_s14, [#allocation6]  }
  0x18   :  { %s834_s30 = scalar_lea.hbm %s1310_s3, 16 }
  0x19   :  { %p835_p8 = scmp.ne.s32.totalorder %s1310_s3, %s834_s30  ;;  %p838_p9 = scmp.lt.u32.totalorder %s834_s30, %s1310_s3 }
  0x1b   :  { %p840_p10 = pnand %p838_p9, %p835_p8 }
  0x1d   :  { %843 = shalt.err (!%p840_p10)
}
  0x1e   :  { %s844_s17 = scalar_lea.vmem %s63_s16, 16  ;;  %s848_s18 = scalar_lea.vmem %s63_s16, 32 }
  0x1f   :  { %p845_p11 = scmp.ne.s32.totalorder %s63_s16, %s844_s17  ;;  %p849_p12 = scmp.lt.s32.totalorder %s63_s16, %s63_s16 }
  0x20   :  { %p850_p13 = scmp.lt.s32.totalorder %s848_s18, %s844_s17 }
  0x22   :  { %p851_p0 = por %p850_p13, %p849_p12 }
  0x24   :  { %p852_p1 = pnand %p851_p0, %p845_p11 }
  0x26   :  { %855 = shalt.err (!%p852_p1)
}
  0x27   :  { %65 = dma.hbm_to_vmem [thread:$0]  %s1310_s3, 16, %s63_s16, [#allocation9]  }
  0x28   :  { %s1070_s19 = smov [#allocation11]   ;;  %s1071_s21 = smov [#allocation14]  }
  0x29   :  { %s84_s20 = sshll.u32 %s1070_s19, 4  ;;  %s106_s22 = sshll.u32 %s1071_s21, 4  ;;  %s85_s20 = int_to_ptr.vmem [resolvable:$true] %s84_s20  ;;  %s107_s22 = int_to_ptr.vmem [resolvable:$true] %s106_s22 }
  0x2a   :  { %s856_s25 = scalar_lea.hbm %s1312_s5, 16 }
  0x2b   :  { %p857_p2 = scmp.ne.s32.totalorder %s1312_s5, %s856_s25  ;;  %p860_p3 = scmp.lt.u32.totalorder %s856_s25, %s1312_s5 }
  0x2d   :  { %p862_p4 = pnand %p860_p3, %p857_p2 }
  0x2f   :  { %865 = shalt.err (!%p862_p4)
}
  0x30   :  { %s866_s3 = scalar_lea.vmem %s85_s20, 16  ;;  %s870_s16 = scalar_lea.vmem %s85_s20, 32 }
  0x31   :  { %p867_p5 = scmp.ne.s32.totalorder %s85_s20, %s866_s3  ;;  %p871_p6 = scmp.lt.s32.totalorder %s85_s20, %s85_s20 }
  0x32   :  { %p872_p7 = scmp.lt.s32.totalorder %s870_s16, %s866_s3 }
  0x34   :  { %p873_p8 = por %p872_p7, %p871_p6 }
  0x36   :  { %p874_p9 = pnand %p873_p8, %p867_p5 }
  0x38   :  { %877 = shalt.err (!%p874_p9)
}
  0x39   :  { %87 = dma.hbm_to_vmem [thread:$0]  %s1312_s5, 16, %s85_s20, [#allocation12]  }
  0x3a   :  { %s878_s15 = scalar_lea.hbm %s1314_s7, 16 }
  0x3b   :  { %p879_p10 = scmp.ne.s32.totalorder %s1314_s7, %s878_s15  ;;  %p882_p11 = scmp.lt.u32.totalorder %s878_s15, %s1314_s7 }
  0x3d   :  { %p884_p12 = pnand %p882_p11, %p879_p10 }
  0x3f   :  { %887 = shalt.err (!%p884_p12)
}
  0x40   :  { %s888_s19 = scalar_lea.vmem %s107_s22, 16  ;;  %s892_s21 = scalar_lea.vmem %s107_s22, 32 }
  0x41   :  { %p889_p13 = scmp.ne.s32.totalorder %s107_s22, %s888_s19  ;;  %p893_p0 = scmp.lt.s32.totalorder %s107_s22, %s107_s22 }
  0x42   :  { %p894_p1 = scmp.lt.s32.totalorder %s892_s21, %s888_s19 }
  0x44   :  { %p895_p2 = por %p894_p1, %p893_p0 }
  0x46   :  { %p896_p3 = pnand %p895_p2, %p889_p13 }
  0x48   :  { %899 = shalt.err (!%p896_p3)
}
  0x49   :  { %109 = dma.hbm_to_vmem [thread:$0]  %s1314_s7, 16, %s107_s22, [#allocation15]  }
  0x4a   :  { %s1072_s23 = smov [#allocation2]   ;;  %s900_s27 = scalar_lea.hbm %s1307_s0, 256 }
  0x4b   :  { %s27_s24 = sshll.u32 %s1072_s23, 4  ;;  %p901_p4 = scmp.ne.s32.totalorder %s1307_s0, %s900_s27  ;;  %s28_s24 = int_to_ptr.vmem [resolvable:$true] %s27_s24 }
  0x4c   :  { %p904_p5 = scmp.lt.u32.totalorder %s900_s27, %s1307_s0 }
  0x4e   :  { %p906_p6 = pnand %p904_p5, %p901_p4 }
  0x50   :  { %909 = shalt.err (!%p906_p6)
}
  0x51   :  { %s910_s30 = scalar_lea.vmem %s28_s24, 256  ;;  %p915_p8 = scmp.lt.s32.totalorder %s28_s24, %s28_s24 }
  0x52   :  { %p911_p7 = scmp.ne.s32.totalorder %s28_s24, %s910_s30  ;;  %p916_p9 = scmp.lt.s32.totalorder %s910_s30, %s910_s30 }
  0x54   :  { %p917_p10 = por %p916_p9, %p915_p8 }
  0x56   :  { %p918_p11 = pnand %p917_p10, %p911_p7 }
  0x58   :  { %921 = shalt.err (!%p918_p11)
}
  0x59   :  { %s1073_s7 = smov 64   ;;  %s1074_s22 = smov 4  }
  0x5a   :  { %33 = dma.hbm_to_vmem [thread:$0]  %s1307_s0, 256, %s28_s24, [#allocation3], %s1073_s7, %s1073_s7, %s1074_s22  }
  0x5b   :  { %s1075_s13 = smov [#allocation7]   ;;  %s1076_s17 = smov [#allocation10]  }
  0x5c   :  { %s49_s15 = sshll.u32 %s1075_s13, 4  ;;  %s71_s18 = sshll.u32 %s1076_s17, 4  ;;  %s50_s15 = int_to_ptr.vmem [resolvable:$true] %s49_s15  ;;  %s72_s18 = int_to_ptr.vmem [resolvable:$true] %s71_s18 }
  0x5d   :  { %s922_s19 = scalar_lea.hbm %s1309_s2, 1024 }
  0x5e   :  { %p923_p12 = scmp.ne.s32.totalorder %s1309_s2, %s922_s19  ;;  %p926_p13 = scmp.lt.u32.totalorder %s922_s19, %s1309_s2 }
  0x60   :  { %p928_p0 = pnand %p926_p13, %p923_p12 }
  0x62   :  { %931 = shalt.err (!%p928_p0)
}
  0x63   :  { %s932_s0 = scalar_lea.vmem %s50_s15, 1024  ;;  %p937_p2 = scmp.lt.s32.totalorder %s50_s15, %s50_s15 }
  0x64   :  { %p933_p1 = scmp.ne.s32.totalorder %s50_s15, %s932_s0  ;;  %p938_p3 = scmp.lt.s32.totalorder %s932_s0, %s932_s0 }
  0x66   :  { %p939_p4 = por %p938_p3, %p937_p2 }
  0x68   :  { %p940_p5 = pnand %p939_p4, %p933_p1 }
  0x6a   :  { %943 = shalt.err (!%p940_p5)
}
  0x6b   :  { %55 = dma.hbm_to_vmem [thread:$0]  %s1309_s2, 1024, %s50_s15, [#allocation6], %s1073_s7, %s1073_s7, %s1074_s22  }
  0x6c   :  { %s944_s28 = scalar_lea.hbm %s1311_s4, 1024 }
  0x6d   :  { %p945_p6 = scmp.ne.s32.totalorder %s1311_s4, %s944_s28  ;;  %p948_p7 = scmp.lt.u32.totalorder %s944_s28, %s1311_s4 }
  0x6f   :  { %p950_p8 = pnand %p948_p7, %p945_p6 }
  0x71   :  { %953 = shalt.err (!%p950_p8)
}
  0x72   :  { %s954_s11 = scalar_lea.vmem %s72_s18, 1024  ;;  %p959_p10 = scmp.lt.s32.totalorder %s72_s18, %s72_s18 }
  0x73   :  { %p955_p9 = scmp.ne.s32.totalorder %s72_s18, %s954_s11  ;;  %p960_p11 = scmp.lt.s32.totalorder %s954_s11, %s954_s11 }
  0x75   :  { %p961_p12 = por %p960_p11, %p959_p10 }
  0x77   :  { %p962_p13 = pnand %p961_p12, %p955_p9 }
  0x79   :  { %965 = shalt.err (!%p962_p13)
}
  0x7a   :  { %77 = dma.hbm_to_vmem [thread:$0]  %s1311_s4, 1024, %s72_s18, [#allocation9], %s1073_s7, %s1073_s7, %s1074_s22  }
  0x7b   :  { %s1077_s13 = smov [#allocation13]   ;;  %s1078_s17 = smov [#allocation16]  }
  0x7c   :  { %s93_s15 = sshll.u32 %s1077_s13, 4  ;;  %s116_s1 = sshll.u32 %s1078_s17, 4  ;;  %s94_s15 = int_to_ptr.vmem [resolvable:$true] %s93_s15  ;;  %s117_s1 = int_to_ptr.vmem [resolvable:$true] %s116_s1 }
  0x7d   :  { %s966_s21 = scalar_lea.hbm %s1313_s6, 1024 }
  0x7e   :  { %p967_p0 = scmp.ne.s32.totalorder %s1313_s6, %s966_s21  ;;  %p970_p1 = scmp.lt.u32.totalorder %s966_s21, %s1313_s6 }
  0x80   :  { %p972_p2 = pnand %p970_p1, %p967_p0 }
  0x82   :  { %975 = shalt.err (!%p972_p2)
}
  0x83   :  { %s976_s4 = scalar_lea.vmem %s94_s15, 1024  ;;  %p981_p4 = scmp.lt.s32.totalorder %s94_s15, %s94_s15 }
  0x84   :  { %p977_p3 = scmp.ne.s32.totalorder %s94_s15, %s976_s4  ;;  %p982_p5 = scmp.lt.s32.totalorder %s976_s4, %s976_s4 }
  0x86   :  { %p983_p6 = por %p982_p5, %p981_p4 }
  0x88   :  { %p984_p7 = pnand %p983_p6, %p977_p3 }
  0x8a   :  { %987 = shalt.err (!%p984_p7)
}
  0x8b   :  { %99 = dma.hbm_to_vmem [thread:$0]  %s1313_s6, 1024, %s94_s15, [#allocation12], %s1073_s7, %s1073_s7, %s1074_s22  }
  0x8c   :  { %s988_s27 = scalar_lea.hbm %s1315_s8, 16 }
  0x8d   :  { %p989_p8 = scmp.ne.s32.totalorder %s1315_s8, %s988_s27  ;;  %p992_p9 = scmp.lt.u32.totalorder %s988_s27, %s1315_s8 }
  0x8f   :  { %p994_p10 = pnand %p992_p9, %p989_p8 }
  0x91   :  { %997 = shalt.err (!%p994_p10)
}
  0x92   :  { %s998_s30 = scalar_lea.vmem %s117_s1, 16  ;;  %s1002_s11 = scalar_lea.vmem %s117_s1, 32 }
  0x93   :  { %p999_p11 = scmp.ne.s32.totalorder %s117_s1, %s998_s30  ;;  %p1003_p12 = scmp.lt.s32.totalorder %s117_s1, %s117_s1 }
  0x94   :  { %p1004_p13 = scmp.lt.s32.totalorder %s1002_s11, %s998_s30 }
  0x96   :  { %p1005_p0 = por %p1004_p13, %p1003_p12 }
  0x98   :  { %p1006_p1 = pnand %p1005_p0, %p999_p11 }
  0x9a   :  { %1009 = shalt.err (!%p1006_p1)
}
  0x9b   :  { %119 = dma.hbm_to_vmem [thread:$0]  %s1315_s8, 16, %s117_s1, [#allocation15]  }
  0x9c   :  { %s1079_s22 = smov [#allocation17]   ;;  %s1010_s15 = scalar_lea.hbm %s1316_s9, 16 }
  0x9d   :  { %s126_s2 = sshll.u32 %s1079_s22, 4  ;;  %p1011_p2 = scmp.ne.s32.totalorder %s1316_s9, %s1010_s15  ;;  %s127_s2 = int_to_ptr.vmem [resolvable:$true] %s126_s2 }
  0x9e   :  { %p1014_p3 = scmp.lt.u32.totalorder %s1010_s15, %s1316_s9 }
  0xa0   :  { %p1016_p4 = pnand %p1014_p3, %p1011_p2 }
  0xa2   :  { %1019 = shalt.err (!%p1016_p4)
}
  0xa3   :  { %s1020_s5 = scalar_lea.vmem %s127_s2, 16  ;;  %s1024_s8 = scalar_lea.vmem %s127_s2, 32 }
  0xa4   :  { %p1021_p5 = scmp.ne.s32.totalorder %s127_s2, %s1020_s5  ;;  %p1025_p6 = scmp.lt.s32.totalorder %s127_s2, %s127_s2 }
  0xa5   :  { %p1026_p7 = scmp.lt.s32.totalorder %s1024_s8, %s1020_s5 }
  0xa7   :  { %p1027_p8 = por %p1026_p7, %p1025_p6 }
  0xa9   :  { %p1028_p9 = pnand %p1027_p8, %p1021_p5 }
  0xab   :  { %1031 = shalt.err (!%p1028_p9)
}
  0xac   :  { %129 = dma.hbm_to_vmem [thread:$0]  %s1316_s9, 16, %s127_s2, [#allocation18]  }
  0xad   :  { %1054 = dma.done.wait [#allocation3], 256  }
  0xae   :  { %1055 = vsyncadd [#allocation3], 4294967040 }
  0xaf   :  { %1056 = dma.done.wait [#allocation6], 1040  }
  0xb0   :  { %1057 = vsyncadd [#allocation6], 4294966256 }
  0xb1   :  { %1058 = dma.done.wait [#allocation9], 1040  }
  0xb2   :  { %1059 = vsyncadd [#allocation9], 4294966256 }
  0xb3   :  { %1060 = dma.done.wait [#allocation12], 1040  }
  0xb4   :  { %1061 = vsyncadd [#allocation12], 4294966256 }
  0xb5   :  { %1062 = dma.done.wait [#allocation15], 32  }
  0xb6   :  { %1063 = vsyncadd [#allocation15], 4294967264 }
  0xb7   :  { %1064 = dma.done.wait [#allocation18], 16  }
  0xb8   :  { %1065 = vsyncadd [#allocation18], 4294967280  ;;  %v782_v0 = vld [vmem:[#allocation7] sm:$0xff]   ;;  %v783_v1 = vld [vmem:[#allocation7 + $0x8] sm:$0xff]   ;;  %v1080_v10 = vmov 0.0   ;;  %vm1081_vm0 = vmmov 0  }
  0xb9   :  { %699 = vmatprep.subr.bf16.mxu0 %v782_v0  ;;  %v784_v2 = vld [vmem:[#allocation7 + $0x10] sm:$0xff]   ;;  %v785_v3 = vld [vmem:[#allocation7 + $0x18] sm:$0xff]   ;;  %v786_v5 = vld [vmem:[#allocation7 + $0x20] sm:$0xff]   ;;  %719 = vmatprep.subr.bf16.mxu1 %v1080_v10  ;;  %vm304_vm1 = vcmask 261120   ;;  %vm578_vm2 = vcmask 1041408   ;;  %s1082_s9 = smov [#allocation19]  }
  0xba   :  { %700 = vmatpush3.bf16.msra.mxu0 %v782_v0  ;;  %v790_v4 = vld [vmem:[#allocation2] sm:$0xff]   ;;  %v789_v8 = vld [vmem:[#allocation7 + $0x38] sm:$0xff]   ;;  %723 = vmatprep.mubr.msk.bf16.mxu1 %vm1081_vm0, %v1080_v10  ;;  %v635_v11 = vld [vmem:[#allocation8] ss:$0 sm:$0xff]  ;;  %s621_s23 = sshll.u32 %s1082_s9, 4  ;;  %s622_s23 = int_to_ptr.vmem [resolvable:$true] %s621_s23 }
  0xbb   :  { %701 = vmatprep.subr.bf16.mxu0 %v783_v1  ;;  %715 = vmatprep.mubr.bf16.mxu0 %v790_v4  ;;  %v787_v6 = vld [vmem:[#allocation7 + $0x28] sm:$0xff]   ;;  %v788_v7 = vld [vmem:[#allocation7 + $0x30] sm:$0xff]   ;;  %v301_v26 = vld [vmem:[#allocation5] sm:$0x1]  ;;  %v583_v4 = vlaneseq  ;;  %s1032_s0 = scalar_lea.vmem %s622_s23, 32  ;;  %p1037_p11 = scmp.lt.s32.totalorder %s622_s23, %s622_s23 }
  0xbc   :  { %v791_v9 = vld [vmem:[#allocation2 + $0x8] sm:$0xff]   ;;  %v792_v27 = vld [vmem:[#allocation10] sm:$0xff]   ;;  %v793_v28 = vld [vmem:[#allocation10 + $0x8] sm:$0xff]   ;;  %p1033_p10 = scmp.ne.s32.totalorder %s622_s23, %s1032_s0  ;;  %p1038_p12 = scmp.lt.s32.totalorder %s1032_s0, %s1032_s0 }
  0xbd   :  { %v794_v29 = vld [vmem:[#allocation10 + $0x10] sm:$0xff]   ;;  %v795_v30 = vld [vmem:[#allocation10 + $0x18] sm:$0xff]   ;;  %v796_v31 = vld [vmem:[#allocation10 + $0x20] sm:$0xff]  }
  0xbe   :  { %702 = vmatpush3.bf16.msra.mxu0 %v783_v1  ;;  %v797_v32 = vld [vmem:[#allocation10 + $0x28] sm:$0xff]   ;;  %v798_v33 = vld [vmem:[#allocation10 + $0x30] sm:$0xff]   ;;  %v799_v34 = vld [vmem:[#allocation10 + $0x38] sm:$0xff]   ;;  %p1039_p13 = por %p1038_p12, %p1037_p11 }
  0xbf   :  { %703 = vmatprep.subr.bf16.mxu0 %v784_v2  ;;  %v800_v35 = vld [vmem:[#allocation13] sm:$0xff]   ;;  %v801_v36 = vld [vmem:[#allocation13 + $0x8] sm:$0xff]   ;;  %v802_v37 = vld [vmem:[#allocation13 + $0x10] sm:$0xff]  }
  0xc0   :  { %v803_v43 = vld [vmem:[#allocation13 + $0x18] sm:$0xff]   ;;  %v804_v44 = vld [vmem:[#allocation13 + $0x20] sm:$0xff]   ;;  %v805_v45 = vld [vmem:[#allocation13 + $0x28] sm:$0xff]   ;;  %p1040_p0 = pnand %p1039_p13, %p1033_p10 }
  0xc1   :  { %v806_v46 = vld [vmem:[#allocation13 + $0x30] sm:$0xff]   ;;  %v807_v47 = vld [vmem:[#allocation13 + $0x38] sm:$0xff]   ;;  %v656_v60 = vld [vmem:[#allocation14] ss:$0 sm:$0xff] }
  0xc2   :  { %704 = vmatpush3.bf16.msra.mxu0 %v784_v2  ;;  %v647_v48 = vld [vmem:[#allocation11] ss:$0 sm:$0xff] }
  0xc3   :  { %705 = vmatprep.subr.bf16.mxu0 %v785_v3 }
  0xc6   :  { %706 = vmatpush3.bf16.msra.mxu0 %v785_v3 }
  0xc7   :  { %707 = vmatprep.subr.bf16.mxu0 %v786_v5 }
  0xca   :  { %708 = vmatpush3.bf16.msra.mxu0 %v786_v5  ;;  %v584_v5 = vand.u32 127, %v583_v4 }
  0xcb   :  { %709 = vmatprep.subr.bf16.mxu0 %v787_v6 }
  0xcc   :  { %vm585_vm3 = vcmp.lt.s32.totalorder %v584_v5, 32 }
  0xce   :  { %710 = vmatpush3.bf16.msra.mxu0 %v787_v6 }
  0xcf   :  { %711 = vmatprep.subr.bf16.mxu0 %v788_v7 }
  0xd2   :  { %712 = vmatpush3.bf16.msra.mxu0 %v788_v7 }
  0xd3   :  { %713 = vmatprep.subr.bf16.mxu0 %v789_v8 }
  0xd6   :  { %714 = vmatpush3.bf16.msra.mxu0 %v789_v8  ;;  %v665_v8 = vsel %vm585_vm3, 1.0, %v1080_v10 }
  0xd7   :  { %747 = vmatprep.subr.bf16.mxu0 %v1080_v10 }
  0xd9   :  { %716 = vmatmul.mubr.bf16.vlgmr.msra.gmra.mrb[0].mxu0 %v791_v9 }
  0xda   :  { %763 = vmatprep.mubr.msk.bf16.mxu0 %vm1081_vm0, %v1080_v10  ;;  %748 = vmatpush3.bf16.msra.mxu0 %v800_v35 }
  0xdb   :  { %749 = vmatprep.subr.bf16.mxu0 %v1080_v10 }
  0xde   :  { %750 = vmatpush3.bf16.msra.mxu0 %v801_v36 }
  0xdf   :  { %751 = vmatprep.subr.bf16.mxu0 %v1080_v10 }
  0xe2   :  { %752 = vmatpush3.bf16.msra.mxu0 %v802_v37 }
  0xe3   :  { %753 = vmatprep.subr.bf16.mxu0 %v1080_v10 }
  0xe6   :  { %754 = vmatpush3.bf16.msra.mxu0 %v803_v43 }
  0xe7   :  { %755 = vmatprep.subr.bf16.mxu0 %v1080_v10 }
  0xea   :  { %756 = vmatpush3.bf16.msra.mxu0 %v804_v44 }
  0xeb   :  { %757 = vmatprep.subr.bf16.mxu0 %v1080_v10 }
  0xee   :  { %758 = vmatpush3.bf16.msra.mxu0 %v805_v45 }
  0xef   :  { %759 = vmatprep.subr.bf16.mxu0 %v1080_v10 }
  0xf2   :  { %760 = vmatpush3.bf16.msra.mxu0 %v806_v46 }
  0xf3   :  { %761 = vmatprep.subr.bf16.mxu0 %v1080_v10 }
  0xf6   :  { %762 = vmatpush3.bf16.msra.mxu0 %v807_v47 }
 0x1ac   :  { %v717_v12 = vpop.f32.mrb[0].mxu0 }
 0x1ad   :  { %v291_v13 = vadd.f32 %v717_v12, %v635_v11  ;;  %v282_v14 = vpop.f32.mrb[1].mxu0 }
 0x1ae   :  { %v283_v15 = vadd.f32 %v635_v11, %v282_v14  ;;  %v718_v16 = vpop.f32.mrb[2].mxu0 }
 0x1af   :  { %v294_v17 = vadd.f32 %v718_v16, %v635_v11  ;;  %v285_v18 = vpop.f32.mrb[3].mxu0  ;;  %v299_v20 = vmax.f32 %v291_v13, 0.0 }
 0x1b0   :  { %v286_v19 = vadd.f32 %v635_v11, %v285_v18  ;;  %v297_v22 = vmax.f32 %v283_v15, 0.0  ;;  %v666_v18 = vld [vmem:[#allocation16] ss:$0 sm:$0xff] }
 0x1b1   :  { %v300_v21 = vmax.f32 %v294_v17, 0.0 }
 0x1b2   :  { %v298_v23 = vmax.f32 %v286_v19, 0.0 }
 0x1b3   :  { %v303_v24 = vpack.c.bf16 %v300_v21, %v299_v20  ;;  %v667_v20 = vld [vmem:[#allocation17] ss:$0 sm:$0xff] }
 0x1b4   :  { %v302_v25 = vpack.c.bf16 %v298_v23, %v297_v22 }
 0x1b6   :  { %720 = vmatpush3.bf16.msra.mxu1 %v302_v25 }
 0x1b7   :  { %721 = vmatprep.subr.bf16.mxu1 %v1080_v10 }
 0x1ba   :  { %722 = vmatpush3.bf16.msra.mxu1 %v303_v24 }
 0x1bb   :  { %727 = vmatprep.subr.bf16.mxu1 %v1080_v10 }
 0x1bd   :  { %724 = vmatmul.mubr.msk.bf16.vlgmr.msra.gmra.mrb[0].mxu1 %vm304_vm1, %v301_v26 }
 0x1be   :  { %728 = vmatpush3.bf16.msra.mxu1 %v792_v27  ;;  %743 = vmatprep.mubr.msk.bf16.mxu1 %vm1081_vm0, %v1080_v10 }
 0x1bf   :  { %729 = vmatprep.subr.bf16.mxu1 %v1080_v10 }
 0x1c2   :  { %730 = vmatpush3.bf16.msra.mxu1 %v793_v28 }
 0x1c3   :  { %731 = vmatprep.subr.bf16.mxu1 %v1080_v10 }
 0x1c6   :  { %732 = vmatpush3.bf16.msra.mxu1 %v794_v29 }
 0x1c7   :  { %733 = vmatprep.subr.bf16.mxu1 %v1080_v10 }
 0x1ca   :  { %734 = vmatpush3.bf16.msra.mxu1 %v795_v30 }
 0x1cb   :  { %735 = vmatprep.subr.bf16.mxu1 %v1080_v10 }
 0x1ce   :  { %736 = vmatpush3.bf16.msra.mxu1 %v796_v31 }
 0x1cf   :  { %737 = vmatprep.subr.bf16.mxu1 %v1080_v10 }
 0x1d2   :  { %738 = vmatpush3.bf16.msra.mxu1 %v797_v32 }
 0x1d3   :  { %739 = vmatprep.subr.bf16.mxu1 %v1080_v10 }
 0x1d6   :  { %740 = vmatpush3.bf16.msra.mxu1 %v798_v33 }
 0x1d7   :  { %741 = vmatprep.subr.bf16.mxu1 %v1080_v10 }
 0x1da   :  { %742 = vmatpush3.bf16.msra.mxu1 %v799_v34 }
 0x290   :  { %v342_v38 = vpop.f32.mrb[0].mxu1 }
 0x291   :  { %v348_v39 = vpack.c.bf16 %v342_v38, %v342_v38  ;;  %v725_v40 = vpop.f32.mrb[1].mxu1 }
 0x292   :  { %v345_v41 = vpop.f32.mrb[2].mxu1 }
 0x293   :  { %v726_v42 = vpop.f32.mrb[3].mxu1  ;;  %744 = vmatmul.mubr.bf16.vlgmr.msra.gmra.mrb[4].mxu1 %v348_v39 }
 0x366   :  { %v454_v49 = vpop.f32.mrb[4].mxu1 }
 0x367   :  { %v455_v50 = vadd.f32 %v647_v48, %v454_v49  ;;  %v745_v51 = vpop.f32.mrb[5].mxu1 }
 0x368   :  { %v457_v52 = vpop.f32.mrb[6].mxu1 }
 0x369   :  { %v461_v53 = vmul.f32 0.70710677, %v455_v50  ;;  %v746_v54 = vpop.f32.mrb[7].mxu1  ;;  %v460_v56 = vmul.f32 0.5, %v455_v50 }
 0x36b   :  { %808 = verf.f32 %v461_v53 }
 0x375   :  { %v809_v55 = vpop.eup %808 }
 0x376   :  { %v463_v57 = vadd.f32 1.0, %v809_v55 }
 0x378   :  { %v464_v58 = vmul.f32 %v463_v57, %v460_v56 }
 0x37a   :  { %v465_v59 = vpack.c.bf16 %v464_v58, %v464_v58 }
 0x37c   :  { %764 = vmatmul.mubr.bf16.vlgmr.msra.gmra.mrb[4].mxu0 %v465_v59 }
 0x44f   :  { %v571_v61 = vpop.f32.mrb[4].mxu0 }
 0x450   :  { %v572_v62 = vadd.f32 %v656_v60, %v571_v61  ;;  %v765_v63 = vpop.f32.mrb[5].mxu0 }
 0x451   :  { %v574_v0 = vpop.f32.mrb[6].mxu0 }
 0x452   :  { %v766_v1 = vpop.f32.mrb[7].mxu0  ;;  %v577_v2 = vadd.f32 %v572_v62, %v455_v50 }
 0x454   :  { %v579_v3 = vsel %vm578_vm2, %v577_v2, 0.0 }
 0x455   :  { %580 = vadd.xlane.f32.xlu0 %v579_v3 }
 0x4e2   :  { %v581_v6 = vpop.xlane.xlu0 %580 }
 0x4e3   :  { %v582_v7 = vmul.f32 0.03125, %v581_v6 }
 0x4e5   :  { %v588_v9 = vsub.f32 %v577_v2, %v582_v7 }
 0x4e7   :  { %v589_v11 = vmul.f32 %v665_v8, %v588_v9 }
 0x4e9   :  { %v590_v12 = vmul.f32 %v589_v11, %v589_v11 }
 0x4eb   :  { %v591_v13 = vsel %vm578_vm2, %v590_v12, 0.0 }
 0x4ec   :  { %592 = vadd.xlane.f32.xlu0 %v591_v13 }
 0x579   :  { %v593_v14 = vpop.xlane.xlu0 %592 }
 0x57a   :  { %v594_v15 = vmul.f32 0.03125, %v593_v14 }
 0x57c   :  { %v595_v16 = vadd.f32 1e-05, %v594_v15 }
 0x57e   :  { %810 = vrsqrt.f32 %v595_v16 }
 0x588   :  { %v811_v17 = vpop.eup %810 }
 0x589   :  { %v597_v19 = vmul.f32 %v811_v17, %v589_v11 }
 0x58b   :  { %v605_v21 = vmul.f32 %v666_v18, %v597_v19 }
 0x58d   :  { %v613_v22 = vadd.f32 %v667_v20, %v605_v21 }
 0x58f   :  { %614 = vst [vmem:[#allocation19] sm:$0x3] %v613_v22 }
 0x590   :  { %1043 = shalt.err (!%p1040_p0)
}
 0x591   :  { %s1044_s24 = scalar_lea.hbm %s1317_s10, 32 }
 0x592   :  { %p1045_p1 = scmp.ne.s32.totalorder %s1317_s10, %s1044_s24  ;;  %p1048_p2 = scmp.lt.u32.totalorder %s1044_s24, %s1317_s10 }
 0x594   :  { %p1050_p3 = pnand %p1048_p2, %p1045_p1 }
 0x596   :  { %1053 = shalt.err (!%p1050_p3)
}
 0x597   :  { %624 = dma.vmem_to_hbm [thread:$0]  %s622_s23, 32, %s1317_s10, [#allocation4]  }
 0x598   :  { %1066 = dma.done.wait [#allocation4], 32  }
 0x599   :  { %1067 = vsyncadd [#allocation4], 4294967264 }
 0x59a   :  { %628 = vsyncpa [#allocation3], 1 }
 0x59b   :  { %629 = vsyncpa [#allocation6], 1 }
 0x59c   :  { %630 = vsyncpa [#allocation9], 1 }
 0x59d   :  { %631 = vsyncpa [#allocation12], 1 }
 0x59e   :  { %632 = vsyncpa [#allocation15], 1 }
 0x59f   :  { %633 = vsyncpa [#allocation18], 1 }
 0x5a0   :  { %634 = vsyncpa [#allocation4], 1 }

</bundles_post_ra>
